<compile_context>
chip_gen: v7x
topology: tpu7x:2x2x1
jax: 0.10.0
libtpu: 0.0.40
codegen_flags: <defaults>
</compile_context>

<pallas_src>
import functools

import jax
import jax.numpy as jnp
from jax.experimental import pallas as pl
from jax.experimental.pallas import tpu as pltpu


def _sharp_ce_kernel(pred_ref, labels_ref, out_ref, *, inv_T, n_valid, block_rows):
    i = pl.program_id(0)

    x = pred_ref[...].astype(jnp.float32)                     # (bn, C) f32
    lab = labels_ref[...]                                      # (bn, 1) int32

    # Numerically-stable logsumexp with the temperature folded into the
    # exponent (exp goes to the EUP slot; one fewer full-tile VPU multiply).
    m = jnp.max(x, axis=-1, keepdims=True)                     # (bn, 1)
    p = jnp.exp((x - m) * inv_T)                                # (bn, C)
    lse = m * inv_T + jnp.log(jnp.sum(p, axis=-1, keepdims=True))  # (bn, 1)

    # Gather x[i, labels[i]] via masked reduce (int32 compare, no float onehot).
    col = jax.lax.broadcasted_iota(jnp.int32, x.shape, 1)      # (bn, C)
    target = jnp.sum(jnp.where(col == lab, x, 0.0),
                     axis=-1, keepdims=True) * inv_T           # (bn, 1)

    # Mask rows past the true batch size (partial last block reads padding).
    row = jax.lax.broadcasted_iota(jnp.int32, (block_rows, 1), 0) + i * block_rows
    loss_rows = jnp.where(row < n_valid, lse - target, 0.0)    # (bn, 1)

    # Lane-dense store: replicate this block's partial sum across a full tile.
    partial = jnp.sum(loss_rows)
    out_ref[...] = jnp.broadcast_to(partial, out_ref.shape).astype(jnp.float32)


def sharp_ce(pred, labels, T=0.5, block_rows=256):
    """pred: (N, C) float (f32 or bf16); labels: (N,) int class indices.

    Returns the scalar f32 SharpCE loss (mean reduction over the batch).
    """
    N, C = pred.shape

    # Pick a row-block size that keeps the double-buffered pred tile plus
    # in-kernel f32 temporaries comfortably inside scoped VMEM on all
    # generations (v7x has the smallest budget).
    row_budget = max(8, (4 << 20) // (C * 4))          # ~4 MiB of f32 per tile
    bn = min(block_rows, row_budget)
    if N <= bn:
        bn = N                                         # single full block
    else:
        bn = max(8, (bn // 8) * 8)                     # (8, 128) tiling rule

    G = pl.cdiv(N, bn)
    n_pad = G * bn

    labels_col = labels.astype(jnp.int32).reshape(N, 1)
    if n_pad != N:
        labels_col = jnp.pad(labels_col, ((0, n_pad - N), (0, 0)))

    partials = pl.pallas_call(
        functools.partial(_sharp_ce_kernel,
                          inv_T=float(1.0 / T), n_valid=N, block_rows=bn),
        out_shape=jax.ShapeDtypeStruct((G, 8, 128), jnp.float32),
        grid_spec=pltpu.PrefetchScalarGridSpec(
            num_scalar_prefetch=0,
            grid=(G,),
            in_specs=[
                pl.BlockSpec((bn, C), lambda i: (i, 0)),   # logits row block
                pl.BlockSpec((bn, 1), lambda i: (i, 0)),   # labels row block
            ],
            out_specs=pl.BlockSpec((1, 8, 128), lambda i: (i, 0, 0)),
        ),
        compiler_params=pltpu.CompilerParams(
            dimension_semantics=("parallel",)),
    )(pred, labels_col)

    # Each block wrote its partial sum replicated over (8, 128); take one lane.
    return jnp.sum(partials[:, 0, 0]) / N


def _reference(pred, labels, T):
    z = pred.astype(jnp.float32) / T
    n = pred.shape[0]
    return jnp.mean(
        jax.scipy.special.logsumexp(z, axis=-1) - z[jnp.arange(n), labels]
    )


if __name__ == "__main__":
    key = jax.random.PRNGKey(0)
    k1, k2, k3, k4 = jax.random.split(key, 4)
    T = 0.5

    # Small case consistent with the module: 8 examples, 16 classes.
    N, C = 8, 16
    pred = jax.random.normal(k1, (N, C), dtype=jnp.float32)
    labels = jax.random.randint(k2, (N,), 0, C, dtype=jnp.int32)

    loss = jax.block_until_ready(sharp_ce(pred, labels, T=T))
    ref = _reference(pred, labels, T)
    assert jnp.allclose(loss, ref, rtol=1e-5, atol=1e-5), (loss, ref)

    # Second check: exercises the batch grid + remainder-block masking path.
    N2, C2 = 40, 128
    pred2 = jax.random.normal(k3, (N2, C2), dtype=jnp.float32)
    labels2 = jax.random.randint(k4, (N2,), 0, C2, dtype=jnp.int32)

    loss2 = jax.block_until_ready(sharp_ce(pred2, labels2, T=T, block_rows=16))
    ref2 = _reference(pred2, labels2, T)
    assert jnp.allclose(loss2, ref2, rtol=1e-5, atol=1e-5), (loss2, ref2)

    print("KERNEL_OK")
</pallas_src>

<mosaic_0001>
module attributes {stable_mosaic.version = 11 : i64} {
  func.func @_sharp_ce_kernel(%arg0: i32, %arg1: memref<8x16xf32, #tpu.memory_space<vmem>>, %arg2: memref<8x1xi32, #tpu.memory_space<vmem>>, %arg3: memref<1x8x128xf32, #tpu.memory_space<vmem>>) attributes {dimension_semantics = [#tpu.dimension_semantics<parallel>], iteration_bounds = array<i64: 1>, scalar_prefetch = 0 : i64, scratch_operands = 0 : i64, tpu.core_type = #tpu.core_type<tc>, window_params = [{transform_indices = @transform_0, window_bounds = array<i64: 8, 16>}, {transform_indices = @transform_1, window_bounds = array<i64: 8, 1>}, {transform_indices = @transform_2, window_bounds = array<i64: 1, 8, 128>}]} {
    %c0 = arith.constant 0 : index
    %c0_0 = arith.constant 0 : index
    %0 = vector.load %arg1[%c0, %c0_0] : memref<8x16xf32, #tpu.memory_space<vmem>>, vector<8x16xf32>
    %c0_1 = arith.constant 0 : index
    %c0_2 = arith.constant 0 : index
    %1 = vector.load %arg2[%c0_1, %c0_2] : memref<8x1xi32, #tpu.memory_space<vmem>>, vector<8x1xi32>
    %cst = arith.constant dense<0xFF800000> : vector<8xf32>
    %2 = vector.multi_reduction <maximumf>, %0, %cst [1] : vector<8x16xf32> to vector<8xf32>
    %3 = vector.shape_cast %2 : vector<8xf32> to vector<8x1xf32>
    %4 = vector.broadcast %3 : vector<8x1xf32> to vector<8x16xf32>
    %5 = arith.subf %0, %4 : vector<8x16xf32>
    %cst_3 = arith.constant 2.000000e+00 : f32
    %6 = vector.broadcast %cst_3 : f32 to vector<8x16xf32>
    %7 = arith.mulf %5, %6 : vector<8x16xf32>
    %8 = math.exp %7 : vector<8x16xf32>
    %cst_4 = arith.constant 2.000000e+00 : f32
    %9 = vector.broadcast %cst_4 : f32 to vector<8x1xf32>
    %10 = arith.mulf %3, %9 : vector<8x1xf32>
    %cst_5 = arith.constant dense<0.000000e+00> : vector<8xf32>
    %11 = vector.multi_reduction <add>, %8, %cst_5 [1] : vector<8x16xf32> to vector<8xf32>
    %12 = vector.shape_cast %11 : vector<8xf32> to vector<8x1xf32>
    %13 = math.log %12 : vector<8x1xf32>
    %14 = arith.addf %10, %13 : vector<8x1xf32>
    %15 = tpu.iota {dimensions = array<i32: 1>} : vector<8x16xi32>
    %16 = vector.broadcast %1 : vector<8x1xi32> to vector<8x16xi32>
    %17 = arith.cmpi eq, %15, %16 : vector<8x16xi32>
    %cst_6 = arith.constant 0.000000e+00 : f32
    %18 = vector.broadcast %cst_6 : f32 to vector<8x16xf32>
    %19 = arith.select %17, %0, %18 : vector<8x16xi1>, vector<8x16xf32>
    %cst_7 = arith.constant dense<0.000000e+00> : vector<8xf32>
    %20 = vector.multi_reduction <add>, %19, %cst_7 [1] : vector<8x16xf32> to vector<8xf32>
    %21 = vector.shape_cast %20 : vector<8xf32> to vector<8x1xf32>
    %cst_8 = arith.constant 2.000000e+00 : f32
    %22 = vector.broadcast %cst_8 : f32 to vector<8x1xf32>
    %23 = arith.mulf %21, %22 : vector<8x1xf32>
    %24 = tpu.iota {dimensions = array<i32: 0>} : vector<8x1xi32>
    %c8_i32 = arith.constant 8 : i32
    %25 = arith.muli %arg0, %c8_i32 : i32
    %26 = vector.broadcast %25 : i32 to vector<8x1xi32>
    %27 = arith.addi %24, %26 : vector<8x1xi32>
    %c8_i32_9 = arith.constant 8 : i32
    %28 = vector.broadcast %c8_i32_9 : i32 to vector<8x1xi32>
    %29 = arith.cmpi slt, %27, %28 : vector<8x1xi32>
    %30 = arith.subf %14, %23 : vector<8x1xf32>
    %cst_10 = arith.constant 0.000000e+00 : f32
    %31 = vector.broadcast %cst_10 : f32 to vector<8x1xf32>
    %32 = arith.select %29, %30, %31 : vector<8x1xi1>, vector<8x1xf32>
    %33 = vector.shape_cast %32 : vector<8x1xf32> to vector<1x8x1xf32>
    %cst_11 = arith.constant dense<0.000000e+00> : vector<1xf32>
    %34 = vector.multi_reduction <add>, %33, %cst_11 [1, 2] : vector<1x8x1xf32> to vector<1xf32>
    %35 = vector.shape_cast %34 : vector<1xf32> to vector<1x1x1xf32>
    %36 = vector.extract %35[0, 0, 0] : f32 from vector<1x1x1xf32>
    %37 = vector.broadcast %36 : f32 to vector<1x8x128xf32>
    %c0_12 = arith.constant 0 : index
    %c0_13 = arith.constant 0 : index
    %c0_14 = arith.constant 0 : index
    %38 = vector.load %arg3[%c0_12, %c0_13, %c0_14] : memref<1x8x128xf32, #tpu.memory_space<vmem>>, vector<1x8x128xf32>
    tpu.vector_store %arg3[%c0_12, %c0_13, %c0_14], %37 {strides = array<i32>} : memref<1x8x128xf32, #tpu.memory_space<vmem>>, vector<1x8x128xf32>,
    return
  }
  func.func @transform_0(%arg0: i32) -> (i32, i32) {
    %c0_i32 = arith.constant 0 : i32
    %c0_i32_0 = arith.constant 0 : i32
    return %arg0, %c0_i32 : i32, i32
  }
  func.func @transform_1(%arg0: i32) -> (i32, i32) {
    %c0_i32 = arith.constant 0 : i32
    %c0_i32_0 = arith.constant 0 : i32
    return %arg0, %c0_i32 : i32, i32
  }
  func.func @transform_2(%arg0: i32) -> (i32, i32, i32) {
    %c0_i32 = arith.constant 0 : i32
    %c0_i32_0 = arith.constant 0 : i32
    %c0_i32_1 = arith.constant 0 : i32
    return %arg0, %c0_i32, %c0_i32_0 : i32, i32, i32
  }
}

</mosaic_0001>

<bundles_post_ra>
// kernel: tpu_custom_call.1
= control target key start
LH: loop header
LB: loop body
LE: loop exit
PB: predicated region body
PF: predicated region fallthrough
CT: control target
= control target key end

     0   :  { %vm14_vm0 = vcmask 130048   ;;  %s146_s0 = inlined_call_operand.vmem [shape: f32[8,16], index: 0, kind: input, shape index: {}]   ;;  %s147_s1 = inlined_call_operand.vmem [shape: s32[8,1], index: 1, kind: input, shape index: {}]   ;;  %s148_s2 = inlined_call_operand.hbm [shape: f32[1,8,128], index: 2, kind: output, shape index: {}]  }
   0x1   :  { %v12_v0 = vld [vmem:[%s146_s0] sm:$0xff] }
   0x2   :  { %7 = vsyncpa [#allocation3], 0  ;;  %v15_v1 = vsel %vm14_vm0, %v12_v0, -inf  ;;  %v108_v2 = vmov 0   ;;  %v13_v3 = vld [vmem:[%s147_s1] sm:$0xff]  ;;  %v29_v8 = vlaneseq  ;;  %vm48_vm2 = vcmask 7168  }
   0x3   :  { %79 = vset.pattern.permute.xlu0 %v108_v2  ;;  %s109_s0 = smov [#allocation2]  }
   0x4   :  { %16 = vmax.xlane.f32.xlu0 %v15_v1  ;;  %v30_v9 = vand.u32 127, %v29_v8  ;;  %s67_s1 = sshll.u32 %s109_s0, 4  ;;  %s68_s1 = int_to_ptr.vmem [resolvable:$true] %s67_s1 }
   0x5   :  { %s84_s14 = scalar_lea.vmem %s68_s1, 128  ;;  %p89_p1 = scmp.lt.s32.totalorder %s68_s1, %s68_s1 }
   0x6   :  { %p85_p0 = scmp.ne.s32.totalorder %s68_s1, %s84_s14  ;;  %p90_p2 = scmp.lt.s32.totalorder %s84_s14, %s84_s14 }
   0x8   :  { %p91_p3 = por %p90_p2, %p89_p1 }
   0xa   :  { %p92_p4 = pnand %p91_p3, %p85_p0 }
  0x1a   :  { %32 = vperm.xlu0 %79, %v13_v3  }
  0x91   :  { %v17_v4 = vpop.xlane.xlu0 %16 }
  0x92   :  { %v18_v5 = vsub.f32 %v12_v0, %v17_v4  ;;  %v22_v18 = vmul.f32 2.0, %v17_v4 }
  0x94   :  { %v19_v6 = vmul.f32 2.0, %v18_v5 }
  0x96   :  { %v20_v7 = vmul.f32 1.442695, %v19_v6 }
  0x98   :  { %80 = vpow2.f32 %v20_v7 }
  0x99   :  { %v33_v10 = vpop.permute.xlu0 %32 }
  0x9a   :  { %vm34_vm1 = vcmp.eq.s32.totalorder %v30_v9, %v33_v10 }
  0x9b   :  { %v35_v12 = vsel %vm34_vm1, %v12_v0, 0.0 }
  0x9c   :  { %v36_v14 = vsel %vm14_vm0, %v35_v12, 0.0 }
  0xa2   :  { %v81_v11 = vpop.eup %80 }
  0xa3   :  { %v23_v13 = vsel %vm14_vm0, %v81_v11, 0.0 }
  0xa4   :  { %24 = vadd.xlane.f32.xlu1 %v23_v13 }
  0xa8   :  { %37 = vadd.xlane.f32.xlu1 %v36_v14 }
 0x131   :  { %v25_v15 = vpop.xlane.xlu1 %24 }
 0x132   :  { %82 = vlog2.f32 %v25_v15 }
 0x135   :  { %v38_v16 = vpop.xlane.xlu1 %37 }
 0x136   :  { %v39_v20 = vmul.f32 2.0, %v38_v16 }
 0x13c   :  { %v83_v17 = vpop.eup %82 }
 0x13d   :  { %v27_v19 = vmul.f32 0.6931472, %v83_v17 }
 0x13f   :  { %v28_v21 = vadd.f32 %v27_v19, %v22_v18 }
 0x141   :  { %v46_v22 = vsub.f32 %v28_v21, %v39_v20 }
 0x143   :  { %v49_v23 = vsel %vm48_vm2, %v46_v22, 0.0 }
 0x144   :  { %50 = vadd.xlane.f32.xlu1 %v49_v23 }
 0x1d1   :  { %v51_v24 = vpop.xlane.xlu1 %50 }
 0x1d2   :  { %v52_v25 = vrot.slane %v51_v24, 4 }
 0x1d4   :  { %v53_v26 = vadd.f32 %v52_v25, %v51_v24 }
 0x1d6   :  { %v54_v27 = vrot.slane %v53_v26, 2 }
 0x1d8   :  { %v55_v28 = vadd.f32 %v54_v27, %v53_v26 }
 0x1da   :  { %v56_v29 = vrot.slane %v55_v28, 1 }
 0x1dc   :  { %v57_v30 = vadd.f32 %v56_v29, %v55_v28 }
 0x1de   :  { %75 = vpush %v57_v30 }
 0x20f   :  { %s76_s13 = spop %75 }
 0x210   :  { %v59_v31 = vstv %s76_s13 }
 0x211   :  { %60 = vst [vmem:[#allocation2] sm:$0xff] %v59_v31 }
 0x212   :  { %95 = shalt.err (!%p92_p4)
}
 0x213   :  { %s96_s17 = scalar_lea.hbm %s148_s2, 128 }
 0x214   :  { %p97_p5 = scmp.ne.s32.totalorder %s148_s2, %s96_s17  ;;  %p100_p6 = scmp.lt.u32.totalorder %s96_s17, %s148_s2 }
 0x216   :  { %p102_p7 = pnand %p100_p6, %p97_p5 }
 0x218   :  { %105 = shalt.err (!%p102_p7)
}
 0x219   :  { %70 = dma.vmem_to_hbm [thread:$0]  %s68_s1, 128, %s148_s2, [#allocation3]  }
 0x21a   :  { %106 = dma.done.wait [#allocation3], 128  }
 0x21b   :  { %107 = vsyncadd [#allocation3], 4294967168 }
 0x21c   :  { %74 = vsyncpa [#allocation3], 1 }

</bundles_post_ra>
